<compile_context>
chip_gen: v7x
topology: tpu7x:2x2x1
jax: 0.10.0
libtpu: 0.0.40
codegen_flags: <defaults>
</compile_context>

<pallas_src>
import functools

import jax
import jax.numpy as jnp
from jax.experimental import pallas as pl
from jax.experimental.pallas import tpu as pltpu

IN_FEATURES = 28 * 28  # 784
LANE = 128


def _round_up(v, m):
    return (v + m - 1) // m * m


F_PAD = _round_up(IN_FEATURES, LANE)  # 896 = 7 * 128 (lane-dense feature dim)


# ----------------------------------------------------------------------------
# Kernels
# ----------------------------------------------------------------------------
def _ae_eval_kernel(x_ref, w1_ref, b1_ref, w2_ref, b2_ref, o_ref):
    """Linear -> ReLU -> (dropout = identity) -> Linear -> ReLU on one batch tile."""
    x = x_ref[...]                                                     # (TB, F_PAD) bf16
    h = jnp.dot(x, w1_ref[...], preferred_element_type=jnp.float32)   # (TB, H) f32
    h = jnp.maximum(h + b1_ref[...], 0.0)                             # bias + ReLU in f32
    y = jnp.dot(h.astype(jnp.bfloat16), w2_ref[...],
                preferred_element_type=jnp.float32)                   # (TB, F_PAD) f32
    y = jnp.maximum(y + b2_ref[...], 0.0)
    o_ref[...] = y.astype(o_ref.dtype)


def _ae_train_kernel(x_ref, w1_ref, b1_ref, w2_ref, b2_ref, bits_ref, o_ref,
                     *, drop_threshold, inv_keep_prob):
    """Same as eval, plus inverted dropout via a uint32-threshold compare."""
    x = x_ref[...]
    h = jnp.dot(x, w1_ref[...], preferred_element_type=jnp.float32)
    h = jnp.maximum(h + b1_ref[...], 0.0)

    # keep iff bits >= round(p * 2^32)  =>  P(drop) ~= p.  No float convert needed.
    keep = (bits_ref[...] >= jnp.uint32(drop_threshold)).astype(jnp.float32)
    h = h * (keep * jnp.float32(inv_keep_prob))

    y = jnp.dot(h.astype(jnp.bfloat16), w2_ref[...],
                preferred_element_type=jnp.float32)
    y = jnp.maximum(y + b2_ref[...], 0.0)
    o_ref[...] = y.astype(o_ref.dtype)


# ----------------------------------------------------------------------------
# Wrapper
# ----------------------------------------------------------------------------
def autoencoder_forward(x, params, *, dropout_p=0.0, training=False,
                        rng_key=None, block_b=256):
    """x: (B, 1, 28, 28) float32 NCHW.  Returns (B, 784) float32."""
    w1, b1, w2, b2 = params
    n = w1.shape[1]
    H = _round_up(n, LANE)                      # pad hidden dim to lane width

    # --- parameter prep: zero-pad to lane-dense shapes, cast matmul inputs to bf16 ---
    w1p = jnp.zeros((F_PAD, H), jnp.bfloat16).at[:IN_FEATURES, :n].set(
        w1.astype(jnp.bfloat16))
    b1p = jnp.zeros((1, H), jnp.float32).at[:, :n].set(
        b1.reshape(1, n).astype(jnp.float32))
    w2p = jnp.zeros((H, F_PAD), jnp.bfloat16).at[:n, :IN_FEATURES].set(
        w2.astype(jnp.bfloat16))
    b2p = jnp.zeros((1, F_PAD), jnp.float32).at[:, :IN_FEATURES].set(
        b2.reshape(1, IN_FEATURES).astype(jnp.float32))

    # --- activation prep: flatten, cast, pad features to F_PAD and batch to tiles ---
    B = x.shape[0]
    xf = x.reshape(B, -1).astype(jnp.bfloat16)
    assert xf.shape[1] == IN_FEATURES
    TB = min(block_b, _round_up(B, 8))          # batch tile (multiple of 8 sublanes)
    B_pad = _round_up(B, TB)
    xf = jnp.pad(xf, ((0, B_pad - B), (0, F_PAD - IN_FEATURES)))
    grid = (B_pad // TB,)

    # --- specs: x/out tiled over batch, weights resident across all tiles ---
    x_spec = pl.BlockSpec((TB, F_PAD), lambda i: (i, 0))
    w1_spec = pl.BlockSpec((F_PAD, H), lambda i: (0, 0))
    b1_spec = pl.BlockSpec((1, H), lambda i: (0, 0))
    w2_spec = pl.BlockSpec((H, F_PAD), lambda i: (0, 0))
    b2_spec = pl.BlockSpec((1, F_PAD), lambda i: (0, 0))
    out_spec = pl.BlockSpec((TB, F_PAD), lambda i: (i, 0))
    out_shape = jax.ShapeDtypeStruct((B_pad, F_PAD), jnp.float32)

    flops = 2 * 2 * B_pad * F_PAD * H           # two GEMMs
    bytes_accessed = (B_pad * F_PAD * 2                  # x in (bf16)
                      + B_pad * F_PAD * 4                # out (f32)
                      + 2 * F_PAD * H * 2                # W1 + W2 (bf16)
                      + (H + F_PAD) * 4)                 # biases (f32)
    cost = pl.CostEstimate(flops=flops, transcendentals=0,
                           bytes_accessed=bytes_accessed)
    cparams = pltpu.CompilerParams(dimension_semantics=("parallel",))

    if (not training) or dropout_p == 0.0:
        out = pl.pallas_call(
            _ae_eval_kernel,
            out_shape=out_shape,
            grid=grid,
            in_specs=[x_spec, w1_spec, b1_spec, w2_spec, b2_spec],
            out_specs=out_spec,
            compiler_params=cparams,
            cost_estimate=cost,
        )(xf, w1p, b1p, w2p, b2p)
        return out[:B, :IN_FEATURES]

    # --- training mode: inverted dropout driven by host-generated uint32 bits ---
    if rng_key is None:
        rng_key = jax.random.PRNGKey(0)
    bits = jax.random.bits(rng_key, (B_pad, H), jnp.uint32)
    bits_spec = pl.BlockSpec((TB, H), lambda i: (i, 0))
    drop_threshold = min(int(round(float(dropout_p) * (1 << 32))), (1 << 32) - 1)
    kernel = functools.partial(_ae_train_kernel,
                               drop_threshold=drop_threshold,
                               inv_keep_prob=1.0 / (1.0 - float(dropout_p)))
    out = pl.pallas_call(
        kernel,
        out_shape=out_shape,
        grid=grid,
        in_specs=[x_spec, w1_spec, b1_spec, w2_spec, b2_spec, bits_spec],
        out_specs=out_spec,
        compiler_params=cparams,
        cost_estimate=cost,
    )(xf, w1p, b1p, w2p, b2p, bits)
    return out[:B, :IN_FEATURES]


# ----------------------------------------------------------------------------
# Params + reference
# ----------------------------------------------------------------------------
def init_params(key, n):
    """Same shapes as nn.Linear (weights pre-transposed to (in, out))."""
    k1, k2, k3, k4 = jax.random.split(key, 4)
    bound1 = 1.0 / jnp.sqrt(IN_FEATURES)
    bound2 = 1.0 / jnp.sqrt(n)
    w1 = jax.random.uniform(k1, (IN_FEATURES, n), jnp.float32, -bound1, bound1)
    b1 = jax.random.uniform(k2, (1, n), jnp.float32, -bound1, bound1)
    w2 = jax.random.uniform(k3, (n, IN_FEATURES), jnp.float32, -bound2, bound2)
    b2 = jax.random.uniform(k4, (1, IN_FEATURES), jnp.float32, -bound2, bound2)
    return w1, b1, w2, b2


def reference_forward(x, params):
    """Pure-JAX eval-mode reference with matching numerics (bf16 in, f32 acc)."""
    w1, b1, w2, b2 = params
    xf = x.reshape(x.shape[0], -1)
    h = jnp.dot(xf.astype(jnp.bfloat16), w1.astype(jnp.bfloat16),
                preferred_element_type=jnp.float32) + b1
    h = jnp.maximum(h, 0.0)
    y = jnp.dot(h.astype(jnp.bfloat16), w2.astype(jnp.bfloat16),
                preferred_element_type=jnp.float32) + b2
    return jnp.maximum(y, 0.0)


# ----------------------------------------------------------------------------
# Main
# ----------------------------------------------------------------------------
if __name__ == "__main__":
    key = jax.random.PRNGKey(0)
    kx, kp, kd = jax.random.split(key, 3)

    B, n, dropout_p = 8, 32, 0.2
    x = jax.random.uniform(kx, (B, 1, 28, 28), jnp.float32)  # NCHW, MNIST-like
    params = init_params(kp, n)

    # Eval mode (dropout = identity) — verified against the pure-JAX reference.
    out = autoencoder_forward(x, params, dropout_p=dropout_p, training=False)
    out = jax.block_until_ready(out)
    ref = reference_forward(x, params)
    assert out.shape == (B, IN_FEATURES)
    assert jnp.allclose(out, ref, atol=5e-3, rtol=5e-3), "mismatch vs reference"

    # Training mode (inverted dropout from streamed uint32 bits) — smoke test.
    out_train = autoencoder_forward(x, params, dropout_p=dropout_p,
                                    training=True, rng_key=kd)
    out_train = jax.block_until_ready(out_train)
    assert out_train.shape == (B, IN_FEATURES)
    assert bool(jnp.all(jnp.isfinite(out_train)))

    print("KERNEL_OK")
</pallas_src>

<mosaic_0001>
module attributes {stable_mosaic.version = 11 : i64} {
  func.func @_ae_eval_kernel(%arg0: i32, %arg1: memref<8x896xbf16, #tpu.memory_space<vmem>>, %arg2: memref<896x128xbf16, #tpu.memory_space<vmem>>, %arg3: memref<1x128xf32, #tpu.memory_space<vmem>>, %arg4: memref<128x896xbf16, #tpu.memory_space<vmem>>, %arg5: memref<1x896xf32, #tpu.memory_space<vmem>>, %arg6: memref<8x896xf32, #tpu.memory_space<vmem>>) attributes {dimension_semantics = [#tpu.dimension_semantics<parallel>], iteration_bounds = array<i64: 1>, scalar_prefetch = 0 : i64, scratch_operands = 0 : i64, tpu.core_type = #tpu.core_type<tc>, window_params = [{transform_indices = @transform_0, window_bounds = array<i64: 8, 896>}, {pipeline_mode = #tpu.pipeline_mode<synchronous>, transform_indices = @transform_1, window_bounds = array<i64: 896, 128>}, {pipeline_mode = #tpu.pipeline_mode<synchronous>, transform_indices = @transform_2, window_bounds = array<i64: 1, 128>}, {pipeline_mode = #tpu.pipeline_mode<synchronous>, transform_indices = @transform_3, window_bounds = array<i64: 128, 896>}, {pipeline_mode = #tpu.pipeline_mode<synchronous>, transform_indices = @transform_4, window_bounds = array<i64: 1, 896>}, {transform_indices = @transform_5, window_bounds = array<i64: 8, 896>}]} {
    %c0 = arith.constant 0 : index
    %c0_0 = arith.constant 0 : index
    %0 = vector.load %arg1[%c0, %c0_0] : memref<8x896xbf16, #tpu.memory_space<vmem>>, vector<8x896xbf16>
    %c0_1 = arith.constant 0 : index
    %c0_2 = arith.constant 0 : index
    %1 = vector.load %arg2[%c0_1, %c0_2] : memref<896x128xbf16, #tpu.memory_space<vmem>>, vector<896x128xbf16>
    %cst = arith.constant dense<0.000000e+00> : vector<8x128xf32>
    %2 = tpu.matmul %0, %1, %cst {dimension_numbers = #tpu.dot_dimension_numbers<[1], [0], [0], [1], [0, 0, 1, 1], [], []>} : vector<8x896xbf16>, vector<896x128xbf16>, vector<8x128xf32> -> vector<8x128xf32>
    %c0_3 = arith.constant 0 : index
    %c0_4 = arith.constant 0 : index
    %3 = vector.load %arg3[%c0_3, %c0_4] : memref<1x128xf32, #tpu.memory_space<vmem>>, vector<1x128xf32>
    %4 = vector.broadcast %3 : vector<1x128xf32> to vector<8x128xf32>
    %5 = arith.addf %2, %4 : vector<8x128xf32>
    %cst_5 = arith.constant 0.000000e+00 : f32
    %6 = vector.broadcast %cst_5 : f32 to vector<8x128xf32>
    %7 = arith.maximumf %5, %6 : vector<8x128xf32>
    %8 = arith.truncf %7 : vector<8x128xf32> to vector<8x128xbf16>
    %c0_6 = arith.constant 0 : index
    %c0_7 = arith.constant 0 : index
    %9 = vector.load %arg4[%c0_6, %c0_7] : memref<128x896xbf16, #tpu.memory_space<vmem>>, vector<128x896xbf16>
    %cst_8 = arith.constant dense<0.000000e+00> : vector<8x896xf32>
    %10 = tpu.matmul %8, %9, %cst_8 {dimension_numbers = #tpu.dot_dimension_numbers<[1], [0], [0], [1], [0, 0, 1, 1], [], []>} : vector<8x128xbf16>, vector<128x896xbf16>, vector<8x896xf32> -> vector<8x896xf32>
    %c0_9 = arith.constant 0 : index
    %c0_10 = arith.constant 0 : index
    %11 = vector.load %arg5[%c0_9, %c0_10] : memref<1x896xf32, #tpu.memory_space<vmem>>, vector<1x896xf32>
    %12 = vector.broadcast %11 : vector<1x896xf32> to vector<8x896xf32>
    %13 = arith.addf %10, %12 : vector<8x896xf32>
    %cst_11 = arith.constant 0.000000e+00 : f32
    %14 = vector.broadcast %cst_11 : f32 to vector<8x896xf32>
    %15 = arith.maximumf %13, %14 : vector<8x896xf32>
    %c0_12 = arith.constant 0 : index
    %c0_13 = arith.constant 0 : index
    %16 = vector.load %arg6[%c0_12, %c0_13] : memref<8x896xf32, #tpu.memory_space<vmem>>, vector<8x896xf32>
    tpu.vector_store %arg6[%c0_12, %c0_13], %15 {strides = array<i32>} : memref<8x896xf32, #tpu.memory_space<vmem>>, vector<8x896xf32>,
    return
  }
  func.func @transform_0(%arg0: i32) -> (i32, i32) {
    %c0_i32 = arith.constant 0 : i32
    %c0_i32_0 = arith.constant 0 : i32
    return %arg0, %c0_i32 : i32, i32
  }
  func.func @transform_1(%arg0: i32) -> (i32, i32) {
    %c0_i32 = arith.constant 0 : i32
    %c0_i32_0 = arith.constant 0 : i32
    %c0_i32_1 = arith.constant 0 : i32
    return %c0_i32, %c0_i32_0 : i32, i32
  }
  func.func @transform_2(%arg0: i32) -> (i32, i32) {
    %c0_i32 = arith.constant 0 : i32
    %c0_i32_0 = arith.constant 0 : i32
    %c0_i32_1 = arith.constant 0 : i32
    return %c0_i32, %c0_i32_0 : i32, i32
  }
  func.func @transform_3(%arg0: i32) -> (i32, i32) {
    %c0_i32 = arith.constant 0 : i32
    %c0_i32_0 = arith.constant 0 : i32
    %c0_i32_1 = arith.constant 0 : i32
    return %c0_i32, %c0_i32_0 : i32, i32
  }
  func.func @transform_4(%arg0: i32) -> (i32, i32) {
    %c0_i32 = arith.constant 0 : i32
    %c0_i32_0 = arith.constant 0 : i32
    %c0_i32_1 = arith.constant 0 : i32
    return %c0_i32, %c0_i32_0 : i32, i32
  }
  func.func @transform_5(%arg0: i32) -> (i32, i32) {
    %c0_i32 = arith.constant 0 : i32
    %c0_i32_0 = arith.constant 0 : i32
    return %arg0, %c0_i32 : i32, i32
  }
}

</mosaic_0001>

<bundles_post_ra>
// kernel: tpu_custom_call.1
= control target key start
LH: loop header
LB: loop body
LE: loop exit
PB: predicated region body
PF: predicated region fallthrough
CT: control target
= control target key end

     0   :  { %10 = vsyncpa [#allocation3], 0  ;;  %s1896_s0 = inlined_call_operand.hbm [shape: bf16[8,896], index: 0, kind: input, shape index: {}]   ;;  %s1897_s1 = inlined_call_operand.hbm [shape: bf16[896,128], index: 1, kind: input, shape index: {}]   ;;  %s1898_s2 = inlined_call_operand.vmem [shape: f32[1,128], index: 2, kind: input, shape index: {}]   ;;  %s1899_s3 = inlined_call_operand.hbm [shape: bf16[128,896], index: 3, kind: input, shape index: {}]   ;;  %s1900_s4 = inlined_call_operand.vmem [shape: f32[1,896], index: 4, kind: input, shape index: {}]   ;;  %s1901_s5 = inlined_call_operand.hbm [shape: f32[8,896], index: 5, kind: output, shape index: {}]  }
   0x1   :  { %11 = vsyncpa [#allocation6], 0 }
   0x2   :  { %12 = vsyncpa [#allocation4], 0  ;;  %s1781_s18 = smov [#allocation5]   ;;  %s1687_s22 = scalar_lea.hbm %s1897_s1, 7168 }
   0x3   :  { %s28_s19 = sshll.u32 %s1781_s18, 4  ;;  %p1688_p0 = scmp.ne.s32.totalorder %s1897_s1, %s1687_s22  ;;  %s29_s19 = int_to_ptr.vmem [resolvable:$true] %s28_s19 }
   0x4   :  { %p1691_p1 = scmp.lt.u32.totalorder %s1687_s22, %s1897_s1 }
   0x6   :  { %p1693_p2 = pnand %p1691_p1, %p1688_p0 }
   0x8   :  { %1696 = shalt.err (!%p1693_p2)
}
   0x9   :  { %s1697_s27 = scalar_lea.vmem %s29_s19, 7168  ;;  %p1702_p4 = scmp.lt.s32.totalorder %s29_s19, %s29_s19 }
   0xa   :  { %p1698_p3 = scmp.ne.s32.totalorder %s29_s19, %s1697_s27  ;;  %p1703_p5 = scmp.lt.s32.totalorder %s1697_s27, %s1697_s27 }
   0xc   :  { %p1704_p6 = por %p1703_p5, %p1702_p4 }
   0xe   :  { %p1705_p7 = pnand %p1704_p6, %p1698_p3 }
  0x10   :  { %1708 = shalt.err (!%p1705_p7)
}
  0x11   :  { %s1782_s28 = smov 64   ;;  %s1783_s29 = smov 4  }
  0x12   :  { %34 = dma.hbm_to_vmem [thread:$0]  %s1897_s1, 7168, %s29_s19, [#allocation6], %s1782_s28, %s1782_s28, %s1783_s29  }
  0x13   :  { %s1784_s7 = smov [#allocation2]   ;;  %s1785_s9 = smov [#allocation7]  }
  0x14   :  { %s19_s8 = sshll.u32 %s1784_s7, 4  ;;  %s42_s10 = sshll.u32 %s1785_s9, 4  ;;  %s20_s8 = int_to_ptr.vmem [resolvable:$true] %s19_s8  ;;  %s43_s10 = int_to_ptr.vmem [resolvable:$true] %s42_s10 }
  0x15   :  { %s1709_s13 = scalar_lea.hbm %s1896_s0, 448 }
  0x16   :  { %p1710_p8 = scmp.ne.s32.totalorder %s1896_s0, %s1709_s13  ;;  %p1713_p9 = scmp.lt.u32.totalorder %s1709_s13, %s1896_s0 }
  0x18   :  { %p1715_p10 = pnand %p1713_p9, %p1710_p8 }
  0x1a   :  { %1718 = shalt.err (!%p1715_p10)
}
  0x1b   :  { %s1719_s1 = scalar_lea.vmem %s20_s8, 448  ;;  %p1724_p12 = scmp.lt.s32.totalorder %s20_s8, %s20_s8 }
  0x1c   :  { %p1720_p11 = scmp.ne.s32.totalorder %s20_s8, %s1719_s1  ;;  %p1725_p13 = scmp.lt.s32.totalorder %s1719_s1, %s1719_s1 }
  0x1e   :  { %p1726_p0 = por %p1725_p13, %p1724_p12 }
  0x20   :  { %p1727_p1 = pnand %p1726_p0, %p1720_p11 }
  0x22   :  { %1730 = shalt.err (!%p1727_p1)
}
  0x23   :  { %22 = dma.hbm_to_vmem [thread:$0]  %s1896_s0, 448, %s20_s8, [#allocation3]  }
  0x24   :  { %s1731_s22 = scalar_lea.hbm %s1899_s3, 7168 }
  0x25   :  { %p1732_p2 = scmp.ne.s32.totalorder %s1899_s3, %s1731_s22  ;;  %p1735_p3 = scmp.lt.u32.totalorder %s1731_s22, %s1899_s3 }
  0x27   :  { %p1737_p4 = pnand %p1735_p3, %p1732_p2 }
  0x29   :  { %1740 = shalt.err (!%p1737_p4)
}
  0x2a   :  { %s1741_s27 = scalar_lea.vmem %s43_s10, 7168  ;;  %p1746_p6 = scmp.lt.s32.totalorder %s43_s10, %s43_s10 }
  0x2b   :  { %p1742_p5 = scmp.ne.s32.totalorder %s43_s10, %s1741_s27  ;;  %p1747_p7 = scmp.lt.s32.totalorder %s1741_s27, %s1741_s27 }
  0x2d   :  { %p1748_p8 = por %p1747_p7, %p1746_p6 }
  0x2f   :  { %p1749_p9 = pnand %p1748_p8, %p1742_p5 }
  0x31   :  { %1752 = shalt.err (!%p1749_p9)
}
  0x32   :  { %s1786_s0 = smov 448   ;;  %s1787_s28 = smov 28  }
  0x33   :  { %48 = dma.hbm_to_vmem [thread:$0]  %s1899_s3, 7168, %s43_s10, [#allocation6], %s1786_s0, %s1786_s0, %s1787_s28  }
  0x34   :  { %1775 = dma.done.wait [#allocation3], 448  }
  0x35   :  { %1776 = vsyncadd [#allocation3], 4294966848 }
  0x36   :  { %1777 = dma.done.wait [#allocation6], 14336  }
  0x37   :  { %1778 = vsyncadd [#allocation6], 4294952960  ;;  %v1544_v0 = vld [vmem:[#allocation5 + $0x40] sm:$0xff]   ;;  %v1548_v4 = vld [vmem:[#allocation5 + $0x48] sm:$0xff]   ;;  %v1788_v42 = vmov 0.0   ;;  %vm1789_vm0 = vmmov 0  }
  0x38   :  { %v1545_v1 = vld [vmem:[#allocation5] sm:$0xff]   ;;  %1409 = vmatprep.subr.bf16.mxu0 %v1544_v0  ;;  %v1549_v5 = vld [vmem:[#allocation5 + $0x8] sm:$0xff]   ;;  %v1552_v8 = vld [vmem:[#allocation5 + $0x50] sm:$0xff]  }
  0x39   :  { %v1546_v2 = vld [vmem:[#allocation5 + $0xc0] sm:$0xff]   ;;  %1410 = vmatpush3.bf16.msra.mxu0 %v1545_v1  ;;  %v1550_v6 = vld [vmem:[#allocation5 + $0xc8] sm:$0xff]   ;;  %v1553_v9 = vld [vmem:[#allocation5 + $0x10] sm:$0xff]  }
  0x3a   :  { %v1547_v3 = vld [vmem:[#allocation5 + $0x80] sm:$0xff]   ;;  %1431 = vmatprep.subr.bf16.mxu1 %v1546_v2  ;;  %1411 = vmatprep.subr.bf16.mxu0 %v1548_v4  ;;  %v1551_v7 = vld [vmem:[#allocation5 + $0x88] sm:$0xff]   ;;  %v1554_v10 = vld [vmem:[#allocation5 + $0xd0] sm:$0xff]  }
  0x3b   :  { %1432 = vmatpush3.bf16.msra.mxu1 %v1547_v3  ;;  %v1555_v11 = vld [vmem:[#allocation5 + $0x90] sm:$0xff]   ;;  %v1556_v12 = vld [vmem:[#allocation5 + $0x58] sm:$0xff]   ;;  %v1560_v16 = vld [vmem:[#allocation5 + $0x60] sm:$0xff]  }
  0x3c   :  { %1433 = vmatprep.subr.bf16.mxu1 %v1550_v6  ;;  %v1557_v13 = vld [vmem:[#allocation5 + $0x18] sm:$0xff]   ;;  %v1561_v17 = vld [vmem:[#allocation5 + $0x20] sm:$0xff]   ;;  %v1564_v20 = vld [vmem:[#allocation5 + $0x68] sm:$0xff]  }
  0x3d   :  { %1412 = vmatpush3.bf16.msra.mxu0 %v1549_v5  ;;  %v1558_v14 = vld [vmem:[#allocation5 + $0xd8] sm:$0xff]   ;;  %v1562_v18 = vld [vmem:[#allocation5 + $0xe0] sm:$0xff]   ;;  %v1565_v21 = vld [vmem:[#allocation5 + $0x28] sm:$0xff]  }
  0x3e   :  { %1413 = vmatprep.subr.bf16.mxu0 %v1552_v8  ;;  %v1559_v15 = vld [vmem:[#allocation5 + $0x98] sm:$0xff]   ;;  %v1563_v19 = vld [vmem:[#allocation5 + $0xa0] sm:$0xff]   ;;  %v1566_v22 = vld [vmem:[#allocation5 + $0xe8] sm:$0xff]  }
  0x3f   :  { %1434 = vmatpush3.bf16.msra.mxu1 %v1551_v7  ;;  %v1567_v23 = vld [vmem:[#allocation5 + $0xa8] sm:$0xff]   ;;  %v1568_v24 = vld [vmem:[#allocation5 + $0x70] sm:$0xff]   ;;  %v1572_v28 = vld [vmem:[#allocation5 + $0x78] sm:$0xff]  }
  0x40   :  { %1435 = vmatprep.subr.bf16.mxu1 %v1554_v10  ;;  %v1569_v25 = vld [vmem:[#allocation5 + $0x30] sm:$0xff]   ;;  %v1573_v29 = vld [vmem:[#allocation5 + $0x38] sm:$0xff]   ;;  %v61_v31 = vld [vmem:[#allocation2] sm:$0xff] }
  0x41   :  { %1414 = vmatpush3.bf16.msra.mxu0 %v1553_v9  ;;  %v1570_v26 = vld [vmem:[#allocation5 + $0xf0] sm:$0xff]   ;;  %v1574_v30 = vld [vmem:[#allocation5 + $0xf8] sm:$0xff]   ;;  %v1290_v32 = vcombine.low %v61_v31, %v61_v31  ;;  %v1291_v33 = vcombine.high %v61_v31, %v61_v31  ;;  %v1578_v35 = vld [vmem:[#allocation5 + $0x140] sm:$0xff]  }
  0x42   :  { %1415 = vmatprep.subr.bf16.mxu0 %v1556_v12  ;;  %v1571_v27 = vld [vmem:[#allocation5 + $0xb0] sm:$0xff]   ;;  %v1577_v34 = vld [vmem:[#allocation5 + $0xb8] sm:$0xff]   ;;  %v1581_v39 = vld [vmem:[#allocation5 + $0x100] sm:$0xff]  }
  0x43   :  { %1436 = vmatpush3.bf16.msra.mxu1 %v1555_v11  ;;  %v62_v36 = vld [vmem:[#allocation2 + $0x8] sm:$0xff]  ;;  %577 = vmatprep.mubr.bf16.mxu0 %v1291_v33  ;;  %v1582_v40 = vld [vmem:[#allocation5 + $0x180] sm:$0xff]   ;;  %v1589_v48 = vld [vmem:[#allocation5 + $0x158] sm:$0xff]  }
  0x44   :  { %1437 = vmatprep.subr.bf16.mxu1 %v1558_v14  ;;  %v1292_v37 = vcombine.low %v62_v36, %v62_v36  ;;  %v1293_v38 = vcombine.high %v62_v36, %v62_v36  ;;  %v1583_v41 = vld [vmem:[#allocation5 + $0x148] sm:$0xff]   ;;  %v1586_v45 = vld [vmem:[#allocation5 + $0x150] sm:$0xff]   ;;  %v1590_v49 = vld [vmem:[#allocation5 + $0x118] sm:$0xff]   ;;  %v1790_v36 = vmov 0  }
  0x45   :  { %1416 = vmatpush3.bf16.msra.mxu0 %v1557_v13  ;;  %v1584_v43 = vld [vmem:[#allocation5 + $0x108] sm:$0xff]   ;;  %v1587_v46 = vld [vmem:[#allocation5 + $0x110] sm:$0xff]   ;;  %v1592_v50 = vld [vmem:[#allocation5 + $0x160] sm:$0xff]  }
  0x46   :  { %1417 = vmatprep.subr.bf16.mxu0 %v1560_v16  ;;  %617 = vmatprep.mubr.bf16.mxu1 %v1293_v38  ;;  %v1585_v44 = vld [vmem:[#allocation5 + $0x188] sm:$0xff]   ;;  %v1588_v47 = vld [vmem:[#allocation5 + $0x190] sm:$0xff]   ;;  %v1591_v51 = vld [vmem:[#allocation5 + $0x198] sm:$0xff]  }
  0x47   :  { %1438 = vmatpush3.bf16.msra.mxu1 %v1559_v15  ;;  %v1593_v52 = vld [vmem:[#allocation5 + $0x120] sm:$0xff]   ;;  %v1595_v53 = vld [vmem:[#allocation5 + $0x168] sm:$0xff]   ;;  %v1598_v56 = vld [vmem:[#allocation5 + $0x170] sm:$0xff]  }
  0x48   :  { %1439 = vmatprep.subr.bf16.mxu1 %v1562_v18  ;;  %v1594_v54 = vld [vmem:[#allocation5 + $0x1a0] sm:$0xff]   ;;  %v1596_v55 = vld [vmem:[#allocation5 + $0x128] sm:$0xff]   ;;  %v1599_v58 = vld [vmem:[#allocation5 + $0x130] sm:$0xff]  }
  0x49   :  { %1418 = vmatpush3.bf16.msra.mxu0 %v1561_v17  ;;  %v1597_v57 = vld [vmem:[#allocation5 + $0x1a8] sm:$0xff]   ;;  %v63_v59 = vld [vmem:[#allocation2 + $0x10] sm:$0xff]  ;;  %v1606_v2 = vld [vmem:[#allocation2 + $0x18] ss:$0 sps:$4 sm:$0xff]  }
  0x4a   :  { %1419 = vmatprep.subr.bf16.mxu0 %v1564_v20  ;;  %v1600_v60 = vld [vmem:[#allocation5 + $0x1b0] sm:$0xff]   ;;  %v1295_v61 = vcombine.high %v63_v59, %v63_v59  ;;  %v1601_v62 = vld [vmem:[#allocation5 + $0x178] sm:$0xff]   ;;  %v1294_v1 = vcombine.low %v63_v59, %v63_v59  ;;  %v1609_v4 = vld [vmem:[#allocation7 + $0x4] ss:$28 sps:$4 sm:$0xff]  }
  0x4b   :  { %1440 = vmatpush3.bf16.msra.mxu1 %v1563_v19  ;;  %v1602_v63 = vld [vmem:[#allocation5 + $0x138] sm:$0xff]   ;;  %v1610_v5 = vld [vmem:[#allocation7 + $0x8] ss:$28 sps:$4 sm:$0xff]   ;;  %v1621_v11 = vld [vmem:[#allocation7 + $0x74] ss:$28 sps:$4 sm:$0xff]  }
  0x4c   :  { %1441 = vmatprep.subr.bf16.mxu1 %v1566_v22  ;;  %v1605_v0 = vld [vmem:[#allocation5 + $0x1b8] sm:$0xff]   ;;  %v1612_v6 = vld [vmem:[#allocation7 + $0xc] ss:$28 sps:$4 sm:$0xff]   ;;  %v1618_v8 = vld [vmem:[#allocation7 + $0x44] ss:$28 sps:$4 sm:$0xff]  }
  0x4d   :  { %1420 = vmatpush3.bf16.msra.mxu0 %v1565_v21  ;;  %v1607_v3 = vld [vmem:[#allocation7] ss:$28 sps:$4 sm:$0xff]   ;;  %v1613_v9 = vld [vmem:[#allocation7 + $0x38] ss:$28 sps:$4 sm:$0xff]   ;;  %v1619_v13 = vld [vmem:[#allocation7 + $0x70] ss:$28 sps:$4 sm:$0xff]  }
  0x4e   :  { %1421 = vmatprep.subr.bf16.mxu0 %v1568_v24  ;;  %v1615_v7 = vld [vmem:[#allocation7 + $0x3c] ss:$28 sps:$4 sm:$0xff]   ;;  %v1627_v15 = vld [vmem:[#allocation7 + $0xac] ss:$28 sps:$4 sm:$0xff]   ;;  %v1630_v16 = vld [vmem:[#allocation7 + $0xb4] ss:$28 sps:$4 sm:$0xff]  }
  0x4f   :  { %1442 = vmatpush3.bf16.msra.mxu1 %v1567_v23  ;;  %v1616_v10 = vld [vmem:[#allocation7 + $0x40] ss:$28 sps:$4 sm:$0xff]   ;;  %v1622_v14 = vld [vmem:[#allocation7 + $0x78] ss:$28 sps:$4 sm:$0xff]   ;;  %v1625_v17 = vld [vmem:[#allocation7 + $0xa8] ss:$28 sps:$4 sm:$0xff]  }
  0x50   :  { %1443 = vmatprep.subr.bf16.mxu1 %v1570_v26  ;;  %v1624_v12 = vld [vmem:[#allocation7 + $0x7c] ss:$28 sps:$4 sm:$0xff]   ;;  %v1628_v18 = vld [vmem:[#allocation7 + $0xb0] ss:$28 sps:$4 sm:$0xff]   ;;  %v1633_v19 = vld [vmem:[#allocation7 + $0xe4] ss:$28 sps:$4 sm:$0xff]  }
  0x51   :  { %1422 = vmatpush3.bf16.msra.mxu0 %v1569_v25  ;;  %v1636_v20 = vld [vmem:[#allocation7 + $0xec] ss:$28 sps:$4 sm:$0xff]   ;;  %v1631_v21 = vld [vmem:[#allocation7 + $0xe0] ss:$28 sps:$4 sm:$0xff]   ;;  %v1637_v25 = vld [vmem:[#allocation7 + $0x118] ss:$28 sps:$4 sm:$0xff]  }
  0x52   :  { %1423 = vmatprep.subr.bf16.mxu0 %v1572_v28  ;;  %v1634_v22 = vld [vmem:[#allocation7 + $0xe8] ss:$28 sps:$4 sm:$0xff]   ;;  %v1639_v23 = vld [vmem:[#allocation7 + $0x11c] ss:$28 sps:$4 sm:$0xff]  }
  0x53   :  { %1444 = vmatpush3.bf16.msra.mxu1 %v1571_v27  ;;  %v1642_v24 = vld [vmem:[#allocation7 + $0x124] ss:$28 sps:$4 sm:$0xff]   ;;  %v1645_v27 = vld [vmem:[#allocation7 + $0x154] ss:$28 sps:$4 sm:$0xff]   ;;  %v1648_v28 = vld [vmem:[#allocation7 + $0x15c] ss:$28 sps:$4 sm:$0xff]  }
  0x54   :  { %1445 = vmatprep.subr.bf16.mxu1 %v1574_v30  ;;  %v1640_v26 = vld [vmem:[#allocation7 + $0x120] ss:$28 sps:$4 sm:$0xff]   ;;  %v1646_v30 = vld [vmem:[#allocation7 + $0x158] ss:$28 sps:$4 sm:$0xff]   ;;  %v1651_v31 = vld [vmem:[#allocation7 + $0x18c] ss:$28 sps:$4 sm:$0xff]  }
  0x55   :  { %1424 = vmatpush3.bf16.msra.mxu0 %v1573_v29  ;;  %v1643_v29 = vld [vmem:[#allocation7 + $0x150] ss:$28 sps:$4 sm:$0xff]   ;;  %v1649_v33 = vld [vmem:[#allocation7 + $0x188] ss:$28 sps:$4 sm:$0xff]  }
  0x56   :  { %1453 = vmatprep.subr.bf16.mxu0 %v1578_v35  ;;  %v1657_v35 = vld [vmem:[#allocation7 + $0x14] ss:$28 sps:$4 sm:$0xff]   ;;  %v1289_v38 = vld [vmem:[%s1898_s2] ss:$0 sm:$0xff] }
  0x57   :  { %1446 = vmatpush3.bf16.msra.mxu1 %v1577_v34  ;;  %v1652_v34 = vld [vmem:[#allocation7 + $0x190] ss:$28 sps:$4 sm:$0xff]  }
  0x58   :  { %578 = vmatmul.mubr.bf16.vlgmr.msra.gmra.mrb[0].mxu0 %v1290_v32  ;;  %1493 = vmatprep.subr.bf16.mxu1 %v1788_v42  ;;  %v1654_v32 = vld [vmem:[#allocation7 + $0x194] ss:$28 sps:$4 sm:$0xff]  }
  0x59   :  { %1454 = vmatpush3.bf16.msra.mxu0 %v1581_v39  ;;  %657 = vmatprep.mubr.bf16.mxu0 %v1295_v61 }
  0x5a   :  { %618 = vmatmul.mubr.bf16.vlgmr.msra.gmra.mrb[0].mxu1 %v1292_v37  ;;  %1455 = vmatprep.subr.bf16.mxu0 %v1583_v41 }
  0x5b   :  { %1494 = vmatpush3.bf16.msra.mxu1 %v1582_v40  ;;  %1509 = vmatprep.mubr.msk.bf16.mxu1 %vm1789_vm0, %v1788_v42 }
  0x5c   :  { %1495 = vmatprep.subr.bf16.mxu1 %v1788_v42 }
  0x5d   :  { %1456 = vmatpush3.bf16.msra.mxu0 %v1584_v43 }
  0x5e   :  { %1457 = vmatprep.subr.bf16.mxu0 %v1586_v45 }
  0x5f   :  { %1496 = vmatpush3.bf16.msra.mxu1 %v1585_v44 }
  0x60   :  { %1497 = vmatprep.subr.bf16.mxu1 %v1788_v42 }
  0x61   :  { %1458 = vmatpush3.bf16.msra.mxu0 %v1587_v46 }
  0x62   :  { %1459 = vmatprep.subr.bf16.mxu0 %v1589_v48 }
  0x63   :  { %1498 = vmatpush3.bf16.msra.mxu1 %v1588_v47 }
  0x64   :  { %1499 = vmatprep.subr.bf16.mxu1 %v1788_v42 }
  0x65   :  { %1460 = vmatpush3.bf16.msra.mxu0 %v1590_v49 }
  0x66   :  { %1461 = vmatprep.subr.bf16.mxu0 %v1592_v50 }
  0x67   :  { %1500 = vmatpush3.bf16.msra.mxu1 %v1591_v51 }
  0x68   :  { %1501 = vmatprep.subr.bf16.mxu1 %v1788_v42 }
  0x69   :  { %1462 = vmatpush3.bf16.msra.mxu0 %v1593_v52 }
  0x6a   :  { %1463 = vmatprep.subr.bf16.mxu0 %v1595_v53 }
  0x6b   :  { %1502 = vmatpush3.bf16.msra.mxu1 %v1594_v54 }
  0x6c   :  { %1503 = vmatprep.subr.bf16.mxu1 %v1788_v42 }
  0x6d   :  { %1464 = vmatpush3.bf16.msra.mxu0 %v1596_v55 }
  0x6e   :  { %1465 = vmatprep.subr.bf16.mxu0 %v1598_v56 }
  0x6f   :  { %1504 = vmatpush3.bf16.msra.mxu1 %v1597_v57 }
  0x70   :  { %1505 = vmatprep.subr.bf16.mxu1 %v1788_v42 }
  0x71   :  { %1466 = vmatpush3.bf16.msra.mxu0 %v1599_v58 }
  0x72   :  { %1467 = vmatprep.subr.bf16.mxu0 %v1601_v62 }
  0x73   :  { %1506 = vmatpush3.bf16.msra.mxu1 %v1600_v60 }
  0x74   :  { %1507 = vmatprep.subr.bf16.mxu1 %v1788_v42 }
  0x75   :  { %1468 = vmatpush3.bf16.msra.mxu0 %v1602_v63  ;;  %v1655_v63 = vld [vmem:[#allocation7 + $0x10] ss:$28 sps:$4 sm:$0xff]  }
  0x76   :  { %1096 = vmatprep.subr.bf16.mxu0 %v1609_v4  ;;  %v1662_v4 = vld [vmem:[#allocation7 + $0x50] ss:$28 sps:$4 sm:$0xff]  }
  0x77   :  { %1508 = vmatpush3.bf16.msra.mxu1 %v1605_v0  ;;  %v1658_v0 = vld [vmem:[#allocation7 + $0x18] ss:$28 sps:$4 sm:$0xff]  }
  0x78   :  { %658 = vmatmul.mubr.bf16.vlgmr.msra.gmra.mrb[4].mxu0 %v1294_v1  ;;  %1137 = vmatprep.subr.bf16.mxu1 %v1612_v6  ;;  %v1663_v6 = vld [vmem:[#allocation7 + $0x80] ss:$28 sps:$4 sm:$0xff]  }
  0x79   :  { %1097 = vmatpush1.bf16.msra.mxu0 %v1607_v3  ;;  %1128 = vmatprep.mubr.bf16.mxu0 %v1790_v36  ;;  %v1659_v3 = vld [vmem:[#allocation7 + $0x48] ss:$28 sps:$4 sm:$0xff]  }
  0x7a   :  { %1510 = vmatmul.mubr.bf16.vlgmr.msra.gmra.mrb[4].mxu1 %v1606_v2  ;;  %1098 = vmatprep.subr.bf16.mxu0 %v1615_v7  ;;  %v1661_v2 = vld [vmem:[#allocation7 + $0x4c] ss:$28 sps:$4 sm:$0xff]  }
  0x7b   :  { %1138 = vmatpush1.bf16.msra.mxu1 %v1610_v5  ;;  %1169 = vmatprep.mubr.bf16.mxu1 %v1790_v36  ;;  %v1665_v5 = vld [vmem:[#allocation7 + $0x84] ss:$28 sps:$4 sm:$0xff]  }
  0x7c   :  { %1139 = vmatprep.subr.bf16.mxu1 %v1618_v8  ;;  %v1666_v7 = vld [vmem:[#allocation7 + $0x88] ss:$28 sps:$4 sm:$0xff]   ;;  %v1669_v8 = vld [vmem:[#allocation7 + $0xbc] ss:$28 sps:$4 sm:$0xff]  }
  0x7d   :  { %1099 = vmatpush1.bf16.msra.mxu0 %v1613_v9  ;;  %v1667_v9 = vld [vmem:[#allocation7 + $0xb8] ss:$28 sps:$4 sm:$0xff]  }
  0x7e   :  { %1100 = vmatprep.subr.bf16.mxu0 %v1621_v11  ;;  %v1673_v11 = vld [vmem:[#allocation7 + $0xf4] ss:$28 sps:$4 sm:$0xff]  }
  0x7f   :  { %1140 = vmatpush1.bf16.msra.mxu1 %v1616_v10  ;;  %v1670_v10 = vld [vmem:[#allocation7 + $0xc0] ss:$28 sps:$4 sm:$0xff]  }
  0x80   :  { %1141 = vmatprep.subr.bf16.mxu1 %v1624_v12  ;;  %v1671_v12 = vld [vmem:[#allocation7 + $0xf0] ss:$28 sps:$4 sm:$0xff]  }
  0x81   :  { %1101 = vmatpush1.bf16.msra.mxu0 %v1619_v13  ;;  %v1674_v13 = vld [vmem:[#allocation7 + $0xf8] ss:$28 sps:$4 sm:$0xff]  }
  0x82   :  { %1102 = vmatprep.subr.bf16.mxu0 %v1627_v15  ;;  %v1675_v15 = vld [vmem:[#allocation7 + $0x128] ss:$28 sps:$4 sm:$0xff]  }
  0x83   :  { %1142 = vmatpush1.bf16.msra.mxu1 %v1622_v14  ;;  %v1677_v14 = vld [vmem:[#allocation7 + $0x12c] ss:$28 sps:$4 sm:$0xff]  }
  0x84   :  { %1143 = vmatprep.subr.bf16.mxu1 %v1630_v16  ;;  %v1678_v16 = vld [vmem:[#allocation7 + $0x130] ss:$28 sps:$4 sm:$0xff]  }
  0x85   :  { %1103 = vmatpush1.bf16.msra.mxu0 %v1625_v17  ;;  %v1681_v17 = vld [vmem:[#allocation7 + $0x164] ss:$28 sps:$4 sm:$0xff]  }
  0x86   :  { %1104 = vmatprep.subr.bf16.mxu0 %v1633_v19  ;;  %v1682_v19 = vld [vmem:[#allocation7 + $0x168] ss:$28 sps:$4 sm:$0xff]  }
  0x87   :  { %1144 = vmatpush1.bf16.msra.mxu1 %v1628_v18  ;;  %v1679_v18 = vld [vmem:[#allocation7 + $0x160] ss:$28 sps:$4 sm:$0xff]  }
  0x88   :  { %1145 = vmatprep.subr.bf16.mxu1 %v1636_v20  ;;  %v1685_v20 = vld [vmem:[#allocation7 + $0x19c] ss:$28 sps:$4 sm:$0xff]  }
  0x89   :  { %1105 = vmatpush1.bf16.msra.mxu0 %v1631_v21  ;;  %v1683_v21 = vld [vmem:[#allocation7 + $0x198] ss:$28 sps:$4 sm:$0xff]  }
  0x8a   :  { %1106 = vmatprep.subr.bf16.mxu0 %v1639_v23  ;;  %v773_v23 = vlaneseq }
  0x8b   :  { %1146 = vmatpush1.bf16.msra.mxu1 %v1634_v22  ;;  %v1686_v22 = vld [vmem:[#allocation7 + $0x1a0] ss:$28 sps:$4 sm:$0xff]  }
  0x8c   :  { %1147 = vmatprep.subr.bf16.mxu1 %v1642_v24  ;;  %v774_v24 = vshrl.u32 %v773_v23, 7 }
  0x8d   :  { %1107 = vmatpush1.bf16.msra.mxu0 %v1637_v25 }
  0x8e   :  { %1108 = vmatprep.subr.bf16.mxu0 %v1645_v27  ;;  %v775_v25 = vsub.s32 0, %v774_v24  ;;  %v771_v27 = vld [vmem:[%s1900_s4] sm:$0xff]  ;;  %s1791_s4 = smov [#allocation8]  }
  0x8f   :  { %1148 = vmatpush1.bf16.msra.mxu1 %v1640_v26  ;;  %v783_v26 = vsub.s32 2, %v774_v24  ;;  %s1279_s8 = sshll.u32 %s1791_s4, 4  ;;  %s1280_s8 = int_to_ptr.vmem [resolvable:$true] %s1279_s8 }
  0x90   :  { %1149 = vmatprep.subr.bf16.mxu1 %v1648_v28  ;;  %v779_v28 = vsub.s32 1, %v774_v24  ;;  %s1753_s9 = scalar_lea.vmem %s1280_s8, 896  ;;  %p1758_p11 = scmp.lt.s32.totalorder %s1280_s8, %s1280_s8 }
  0x91   :  { %1109 = vmatpush1.bf16.msra.mxu0 %v1643_v29  ;;  %v787_v29 = vsub.s32 3, %v774_v24  ;;  %p1754_p10 = scmp.ne.s32.totalorder %s1280_s8, %s1753_s9  ;;  %p1759_p12 = scmp.lt.s32.totalorder %s1753_s9, %s1753_s9 }
  0x92   :  { %1110 = vmatprep.subr.bf16.mxu0 %v1651_v31  ;;  %v784_v31 = vrot.slane %v771_v27, %v783_v26 }
  0x93   :  { %1150 = vmatpush1.bf16.msra.mxu1 %v1646_v30  ;;  %v776_v30 = vrot.slane %v771_v27, %v775_v25  ;;  %p1760_p13 = por %p1759_p12, %p1758_p11 }
  0x94   :  { %1151 = vmatprep.subr.bf16.mxu1 %v1654_v32  ;;  %v780_v32 = vrot.slane %v771_v27, %v779_v28 }
  0x95   :  { %1111 = vmatpush1.bf16.msra.mxu0 %v1649_v33  ;;  %v788_v33 = vrot.slane %v771_v27, %v787_v29  ;;  %p1761_p0 = pnand %p1760_p13, %p1754_p10 }
  0x96   :  { %1178 = vmatprep.subr.bf16.mxu0 %v1657_v35 }
  0x97   :  { %1152 = vmatpush1.bf16.msra.mxu1 %v1652_v34 }
  0x98   :  { %1513 = vmatprep.subr.bf16.mxu1 %v1788_v42 }
 0x12b   :  { %v1425_v37 = vpop.f32.mrb[0].mxu0 }
 0x12c   :  { %v1426_v39 = vpop.f32.mrb[1].mxu0 }
 0x12d   :  { %v1427_v40 = vadd.f32 %v1426_v39, %v1425_v37  ;;  %v1428_v41 = vpop.f32.mrb[2].mxu0  ;;  %v1447_v43 = vpop.f32.mrb[0].mxu1 }
 0x12e   :  { %v1429_v44 = vpop.f32.mrb[3].mxu0  ;;  %v1448_v45 = vpop.f32.mrb[1].mxu1 }
 0x12f   :  { %v580_v46 = vadd.f32 %v1427_v40, %v1289_v38  ;;  %v1449_v47 = vadd.f32 %v1448_v45, %v1447_v43  ;;  %v1450_v48 = vpop.f32.mrb[2].mxu1 }
 0x130   :  { %v1451_v49 = vpop.f32.mrb[3].mxu1 }
 0x131   :  { %v620_v50 = vadd.f32 %v1449_v47, %v580_v46 }
 0x14b   :  { %v1469_v51 = vpop.f32.mrb[4].mxu0 }
 0x14c   :  { %v1470_v52 = vpop.f32.mrb[5].mxu0 }
 0x14d   :  { %v1471_v53 = vadd.f32 %v1470_v52, %v1469_v51  ;;  %v1472_v54 = vpop.f32.mrb[6].mxu0  ;;  %v699_v55 = vpop.f32.mrb[4].mxu1  ;;  %v799_v51 = vsub.s32 6, %v774_v24  ;;  %v795_v52 = vsub.s32 5, %v774_v24 }
 0x14e   :  { %v1473_v56 = vpop.f32.mrb[7].mxu0  ;;  %v1511_v57 = vpop.f32.mrb[5].mxu1 }
 0x14f   :  { %v660_v58 = vadd.f32 %v1471_v53, %v620_v50  ;;  %v702_v59 = vpop.f32.mrb[6].mxu1  ;;  %v791_v50 = vsub.s32 4, %v774_v24  ;;  %v800_v54 = vrot.slane %v771_v27, %v799_v51 }
 0x150   :  { %v1512_v60 = vpop.f32.mrb[7].mxu1 }
 0x151   :  { %v700_v61 = vadd.f32 %v699_v55, %v660_v58  ;;  %v792_v53 = vrot.slane %v771_v27, %v791_v50  ;;  %v796_v55 = vrot.slane %v771_v27, %v795_v52 }
 0x153   :  { %v705_v62 = vmax.f32 %v700_v61, 0.0 }
 0x155   :  { %v706_v1 = vpack.c.bf16 %v705_v62, %v705_v62 }
 0x157   :  { %1129 = vmatmul.mubr.bf16.vlgmr.msra.gmra.mrb[8].mxu0 %v706_v1  ;;  %1170 = vmatmul.mubr.bf16.vlgmr.msra.gmra.mrb[8].mxu1 %v706_v1 }
 0x158   :  { %1179 = vmatpush1.bf16.msra.mxu0 %v1655_v63  ;;  %1514 = vmatpush3.bf16.msra.mxu1 %v1658_v0 }
 0x159   :  { %1180 = vmatprep.subr.bf16.mxu0 %v1661_v2  ;;  %1515 = vmatprep.subr.bf16.mxu1 %v1788_v42 }
 0x15a   :  { %1210 = vmatprep.mubr.bf16.mxu0 %v1790_v36  ;;  %1529 = vmatprep.mubr.msk.bf16.mxu1 %vm1789_vm0, %v1788_v42 }
 0x15c   :  { %1181 = vmatpush1.bf16.msra.mxu0 %v1659_v3  ;;  %1516 = vmatpush3.bf16.msra.mxu1 %v1662_v4 }
 0x15d   :  { %1182 = vmatprep.subr.bf16.mxu0 %v1665_v5  ;;  %1517 = vmatprep.subr.bf16.mxu1 %v1788_v42 }
 0x160   :  { %1183 = vmatpush1.bf16.msra.mxu0 %v1663_v6  ;;  %1518 = vmatpush3.bf16.msra.mxu1 %v1666_v7 }
 0x161   :  { %1184 = vmatprep.subr.bf16.mxu0 %v1669_v8  ;;  %1519 = vmatprep.subr.bf16.mxu1 %v1788_v42 }
 0x164   :  { %1185 = vmatpush1.bf16.msra.mxu0 %v1667_v9  ;;  %1520 = vmatpush3.bf16.msra.mxu1 %v1670_v10 }
 0x165   :  { %1186 = vmatprep.subr.bf16.mxu0 %v1673_v11  ;;  %1521 = vmatprep.subr.bf16.mxu1 %v1788_v42 }
 0x168   :  { %1187 = vmatpush1.bf16.msra.mxu0 %v1671_v12  ;;  %1522 = vmatpush3.bf16.msra.mxu1 %v1674_v13 }
 0x169   :  { %1188 = vmatprep.subr.bf16.mxu0 %v1677_v14  ;;  %1523 = vmatprep.subr.bf16.mxu1 %v1788_v42 }
 0x16c   :  { %1189 = vmatpush1.bf16.msra.mxu0 %v1675_v15  ;;  %1524 = vmatpush3.bf16.msra.mxu1 %v1678_v16 }
 0x16d   :  { %1190 = vmatprep.subr.bf16.mxu0 %v1681_v17  ;;  %1525 = vmatprep.subr.bf16.mxu1 %v1788_v42 }
 0x170   :  { %1191 = vmatpush1.bf16.msra.mxu0 %v1679_v18  ;;  %1526 = vmatpush3.bf16.msra.mxu1 %v1682_v19 }
 0x171   :  { %1192 = vmatprep.subr.bf16.mxu0 %v1685_v20  ;;  %1527 = vmatprep.subr.bf16.mxu1 %v1788_v42 }
 0x174   :  { %1193 = vmatpush1.bf16.msra.mxu0 %v1683_v21  ;;  %1528 = vmatpush3.bf16.msra.mxu1 %v1686_v22 }
 0x177   :  { %1211 = vmatmul.mubr.bf16.vlgmr.msra.gmra.mrb[12].mxu0 %v706_v1  ;;  %1530 = vmatmul.mubr.bf16.vlgmr.msra.gmra.mrb[12].mxu1 %v706_v1 }
 0x22a   :  { %v1130_v34 = vpop.f32.mrb[8].mxu0  ;;  %v1171_v42 = vpop.f32.mrb[8].mxu1 }
 0x22b   :  { %v1131_v35 = vadd.f32 %v1130_v34, %v776_v30  ;;  %v1172_v36 = vadd.f32 %v1171_v42, %v784_v31  ;;  %v1132_v37 = vpop.f32.mrb[9].mxu0  ;;  %v1173_v38 = vpop.f32.mrb[9].mxu1 }
 0x22c   :  { %v1133_v39 = vadd.f32 %v1132_v37, %v780_v32  ;;  %v1174_v40 = vadd.f32 %v1173_v38, %v788_v33  ;;  %v1134_v41 = vpop.f32.mrb[10].mxu0  ;;  %v1175_v43 = vpop.f32.mrb[10].mxu1 }
 0x22d   :  { %v1259_v44 = vmax.f32 %v1131_v35, 0.0  ;;  %v1261_v45 = vmax.f32 %v1172_v36, 0.0  ;;  %v1135_v46 = vpop.f32.mrb[11].mxu0  ;;  %v1176_v47 = vpop.f32.mrb[11].mxu1 }
 0x22e   :  { %v1260_v48 = vmax.f32 %v1133_v39, 0.0  ;;  %v1262_v49 = vmax.f32 %v1174_v40, 0.0 }
 0x22f   :  { %1266 = vst [vmem:[#allocation8] sm:$0xff] %v1259_v44  ;;  %1268 = vst [vmem:[#allocation8 + $0x10] sm:$0xff] %v1261_v45 }
 0x230   :  { %1267 = vst [vmem:[#allocation8 + $0x8] sm:$0xff] %v1260_v48  ;;  %1269 = vst [vmem:[#allocation8 + $0x18] sm:$0xff] %v1262_v49 }
 0x24a   :  { %v1212_v56 = vpop.f32.mrb[12].mxu0  ;;  %v1253_v57 = vpop.f32.mrb[12].mxu1 }
 0x24b   :  { %v1213_v58 = vadd.f32 %v1212_v56, %v792_v53  ;;  %v1254_v59 = vadd.f32 %v1253_v57, %v800_v54  ;;  %v1214_v60 = vpop.f32.mrb[13].mxu0  ;;  %v1531_v61 = vpop.f32.mrb[13].mxu1 }
 0x24c   :  { %v1215_v62 = vadd.f32 %v1214_v60, %v796_v55  ;;  %v1216_v63 = vpop.f32.mrb[14].mxu0  ;;  %v1256_v0 = vpop.f32.mrb[14].mxu1 }
 0x24d   :  { %v1263_v1 = vmax.f32 %v1213_v58, 0.0  ;;  %v1265_v2 = vmax.f32 %v1254_v59, 0.0  ;;  %v1217_v3 = vpop.f32.mrb[15].mxu0  ;;  %v1532_v4 = vpop.f32.mrb[15].mxu1 }
 0x24e   :  { %v1264_v5 = vmax.f32 %v1215_v62, 0.0 }
 0x24f   :  { %1270 = vst [vmem:[#allocation8 + $0x20] sm:$0xff] %v1263_v1  ;;  %1272 = vst [vmem:[#allocation8 + $0x30] sm:$0xff] %v1265_v2 }
 0x250   :  { %1271 = vst [vmem:[#allocation8 + $0x28] sm:$0xff] %v1264_v5 }
 0x251   :  { %1764 = shalt.err (!%p1761_p0)
}
 0x252   :  { %s1765_s12 = scalar_lea.hbm %s1901_s5, 896 }
 0x253   :  { %p1766_p1 = scmp.ne.s32.totalorder %s1901_s5, %s1765_s12  ;;  %p1769_p2 = scmp.lt.u32.totalorder %s1765_s12, %s1901_s5 }
 0x255   :  { %p1771_p3 = pnand %p1769_p2, %p1766_p1 }
 0x257   :  { %1774 = shalt.err (!%p1771_p3)
}
 0x258   :  { %1282 = dma.vmem_to_hbm [thread:$0]  %s1280_s8, 896, %s1901_s5, [#allocation4]  }
 0x259   :  { %1779 = dma.done.wait [#allocation4], 896  }
 0x25a   :  { %1780 = vsyncadd [#allocation4], 4294966400 }
 0x25b   :  { %1286 = vsyncpa [#allocation3], 1 }
 0x25c   :  { %1287 = vsyncpa [#allocation6], 1 }
 0x25d   :  { %1288 = vsyncpa [#allocation4], 1 }

</bundles_post_ra>
